<compile_context>
chip_gen: v7x
topology: tpu7x:2x2x1
jax: 0.10.0
libtpu: 0.0.40
codegen_flags: <defaults>
</compile_context>

<pallas_src>
import functools

import jax
import jax.numpy as jnp
from jax.experimental import pallas as pl
from jax.experimental.pallas import tpu as pltpu

BN_EPS = 1e-5


# ------------------------------ fused kernel -------------------------------

def c3_fused_kernel(x_ref, w12_ref, b12_ref, wm1_ref, bm1_ref, wm2_ref,
                    bm2_ref, w3h_ref, w3y_ref, b3_ref, valid_ref, cm1_ref,
                    cp1_ref, o_ref, *, c_hid, img_w, body_off, body_len, add,
                    approx_silu):
    """Whole C3 forward for one (image, lane-tile) grid step.

    Shapes (SPAN = body_len + 2*halo lanes; channels padded to cm multiple):
      x_ref   : (Cin, SPAN)        input tile + halo, lane-dense pixels
      w12_ref : (2*c_hid, Cin)     fused cv1|cv2 1x1 weights (BN folded)
      b12_ref : (2*c_hid, 1)
      wm1_ref : (n, c_hid, c_hid)  bottleneck 1x1 weights
      wm2_ref : (n, 9, c_hid, c_hid) bottleneck 3x3 weights, one (O,I) per tap
      bm*_ref : (n, c_hid, 1)
      w3h_ref : (Cout, c_hid)      cv3 weights applied to bottleneck chain
      w3y_ref : (Cout, c_hid)      cv3 weights applied to cv2's output
      b3_ref  : (Cout, 1)
      valid_ref/cm1_ref/cp1_ref : (1, SPAN) f32 masks (real pixel / col-1 ok /
                                   col+1 ok)
      o_ref   : (Cout, body_len)
    """
    f32 = jnp.float32
    dt = w12_ref.dtype                      # MXU operand dtype (f32 or bf16)
    span = x_ref.shape[-1]

    def silu(v):                            # v is f32; exp + reciprocal -> EUP
        return v * pl.reciprocal(1.0 + jnp.exp(-v), approx=approx_silu)

    # cv1 and cv2 fused into a single matmul over the shared input.
    y12 = jnp.dot(w12_ref[...], x_ref[...], preferred_element_type=f32)
    y12 = silu(y12 + b12_ref[...])
    h = y12[:c_hid, :]                      # cv1 path -> bottleneck chain
    y2 = y12[c_hid:, :]                     # cv2 path -> straight to cv3

    valid = valid_ref[...]                  # 1.0 on real image pixels
    cm1 = cm1_ref[...]                      # destination col has a left nbr
    cp1 = cp1_ref[...]                      # destination col has a right nbr

    n_btl = wm1_ref.shape[0]
    for i in range(n_btl):                  # static unroll over bottlenecks
        # Bottleneck 1x1 conv.
        t = jnp.dot(wm1_ref[i], h.astype(dt), preferred_element_type=f32)
        # Zero non-pixel lanes (halo + SiLU(bias) garbage) so vertical
        # out-of-image taps read zeros -> no per-tap row masks needed.
        t = silu(t + bm1_ref[i]) * valid
        # Column-shifted (+ column-masked) source maps (XLU rolls).
        cols = (pltpu.roll(t, shift=1, axis=1) * cm1,          # src col-1
                t,                                             # src col
                pltpu.roll(t, shift=span - 1, axis=1) * cp1)   # src col+1
        # Bottleneck 3x3: accumulate 9 taps with 9 dots; NO (9*c_, SPAN)
        # concat is ever materialized (the old kernel's biggest VMEM hog).
        acc = jnp.dot(wm2_ref[i, 4], t.astype(dt), preferred_element_type=f32)
        for oy in (-1, 0, 1):
            for ox in (-1, 0, 1):
                if oy == 0 and ox == 0:
                    continue
                k = (oy + 1) * 3 + (ox + 1)
                src = cols[ox + 1]
                tap = src if oy == 0 else pltpu.roll(
                    src, shift=(-oy * img_w) % span, axis=1)
                acc = acc + jnp.dot(wm2_ref[i, k], tap.astype(dt),
                                    preferred_element_type=f32)
        u = silu(acc + bm2_ref[i])
        h = h + u if add else u             # shortcut

    # concat + cv3 fused over the tile body only:
    #   cv3(cat(h, y2)) == W3h @ h + W3y @ y2 + b3
    hb = h[:, body_off:body_off + body_len].astype(dt)
    yb = y2[:, body_off:body_off + body_len].astype(dt)
    out = (jnp.dot(w3h_ref[...], hb, preferred_element_type=f32)
           + jnp.dot(w3y_ref[...], yb, preferred_element_type=f32)
           + b3_ref[...])
    o_ref[...] = silu(out).astype(o_ref.dtype)


# ------------------------------ wrapper ------------------------------------

def _rup(x, m):
    return ((x + m - 1) // m) * m


def _cdiv(a, b):
    return -(-a // b)


def _fold_bn(p):
    """Fold BatchNorm (eval-mode stats) into the conv: (w * scale, bias)."""
    scale = p['bn_gamma'] / jnp.sqrt(p['bn_var'] + BN_EPS)
    w = p['w'] * scale[:, None, None, None]
    b = p['bn_beta'] - p['bn_mean'] * scale
    return w, b


def _pad2(a, rows, cols):
    return jnp.pad(a, ((0, rows - a.shape[0]), (0, cols - a.shape[1])))


def _pad1(a, n):
    return jnp.pad(a, (0, n - a.shape[0]))


def c3_forward(x_nchw, params, io_dtype=None, max_tile_lanes=4096):
    """Fused C3 forward via one pallas_call.  Input/output are NCHW.

    io_dtype=None -> f32 everywhere; io_dtype=jnp.bfloat16 -> bf16 I/O and
    bf16 MXU operands (f32 accumulation, f32 element-wise math inside).
    """
    N, cin, H, W = x_nchw.shape
    c_, cout = params['c_'], params['cout']
    nb = len(params['m'])
    assert nb >= 1, "C3 with n=0 bottlenecks is not supported"
    add = params['add']

    use_lp = io_dtype is not None                      # bf16 MXU/I-O path
    cm = 16 if use_lp else 8                           # sublane packing
    cp, cinp, coutp = _rup(c_, cm), _rup(cin, cm), _rup(cout, cm)

    # ---- spatial tiling of the flat pixel axis (lane-dense) ----
    P = H * W
    body = max(128, _rup(int(max_tile_lanes), 128))
    rt = max(1, _cdiv(_rup(P, 128), body))             # number of lane tiles
    L = _rup(_cdiv(P, rt), 128)                        # body lanes per tile
    HL = _rup(nb * (W + 1), 128)                       # halo lanes per side
    span = L + 2 * HL
    s_tot = rt * L + 2 * HL

    # ---- fold BN + pad channels + fuse weights (trace-time glue) ----
    w1, b1 = _fold_bn(params['cv1'])
    w2, b2 = _fold_bn(params['cv2'])
    w12 = jnp.concatenate([_pad2(w1[:, :, 0, 0], cp, cinp),
                           _pad2(w2[:, :, 0, 0], cp, cinp)], axis=0)
    b12 = jnp.concatenate([_pad1(b1, cp), _pad1(b2, cp)])[:, None]

    wm1, bm1, wm2, bm2 = [], [], [], []
    for bp in params['m']:
        wa, ba = _fold_bn(bp['cv1'])
        wm1.append(_pad2(wa[:, :, 0, 0], cp, cp))
        bm1.append(_pad1(ba, cp)[:, None])
        wb, bb = _fold_bn(bp['cv2'])                             # (c_,c_,3,3)
        wb = jnp.pad(wb, ((0, cp - c_), (0, cp - c_), (0, 0), (0, 0)))
        wb = jnp.transpose(wb, (2, 3, 0, 1)).reshape(9, cp, cp)  # tap-major
        wm2.append(wb)
        bm2.append(_pad1(bb, cp)[:, None])
    wm1, bm1 = jnp.stack(wm1), jnp.stack(bm1)
    wm2, bm2 = jnp.stack(wm2), jnp.stack(bm2)

    w3, b3 = _fold_bn(params['cv3'])
    w3 = w3[:, :, 0, 0]
    w3h = _pad2(w3[:, :c_], coutp, cp)      # applies to bottleneck chain h
    w3y = _pad2(w3[:, c_:], coutp, cp)      # applies to cv2 output y2
    b3 = _pad1(b3, coutp)[:, None]

    # ---- masks: 1 valid-pixel mask + 2 column masks (kept in f32) ----
    s_idx = jnp.arange(s_tot, dtype=jnp.int32)
    pix = s_idx - HL
    valid_g = ((pix >= 0) & (pix < P)).astype(jnp.float32)
    col = jnp.mod(pix, W)                   # periodic extension over the pads
    cm1_g = (col >= 1).astype(jnp.float32)
    cp1_g = (col <= W - 2).astype(jnp.float32)

    def _tiles1d(g):
        return jnp.stack([g[t * L:t * L + span] for t in range(rt)])[:, None, :]

    valid_t, cm1_t, cp1_t = _tiles1d(valid_g), _tiles1d(cm1_g), _tiles1d(cp1_g)

    # ---- input: NCHW -> zero-haloed flat pixels -> per-tile windows ----
    xf = jnp.pad(x_nchw.reshape(N, cin, P),
                 ((0, 0), (0, cinp - cin), (HL, s_tot - HL - P)))
    # For rt > 1 this duplicates the halo lanes in HBM (see TODO at top).
    x_tiles = jnp.stack([xf[:, :, t * L:t * L + span] for t in range(rt)],
                        axis=1)                          # (N, rt, cinp, span)

    if use_lp:                    # bf16 I/O + bf16 MXU operands, f32 accum
        x_tiles = x_tiles.astype(jnp.bfloat16)
        w12 = w12.astype(jnp.bfloat16)
        wm1 = wm1.astype(jnp.bfloat16)
        wm2 = wm2.astype(jnp.bfloat16)
        w3h = w3h.astype(jnp.bfloat16)
        w3y = w3y.astype(jnp.bfloat16)

    # ---- scoped-VMEM budget from the actual per-step footprint ----
    isz = 2 if use_lp else 4
    wbytes = ((w12.size + wm1.size + wm2.size + w3h.size + w3y.size) * isz
              + (b12.size + bm1.size + bm2.size + b3.size) * 4)
    blk_io = (cinp * span + coutp * L) * isz + 3 * span * 4
    interm = 12 * cp * span * 4             # h, y2, t, rolled taps, acc (f32)
    est = 2 * (blk_io + wbytes) + interm    # x2: default double-buffering
    vmem_limit = int(min(max(2 * est, 32 * 2 ** 20), 100 * 2 ** 20))

    kernel = functools.partial(c3_fused_kernel, c_hid=cp, img_w=W,
                               body_off=HL, body_len=L, add=add,
                               approx_silu=use_lp)

    out = pl.pallas_call(
        kernel,
        out_shape=jax.ShapeDtypeStruct((N, coutp, rt * L), x_tiles.dtype),
        grid=(N, rt),
        in_specs=[
            pl.BlockSpec((None, None, cinp, span), lambda b, t: (b, t, 0, 0)),
            pl.BlockSpec((2 * cp, cinp), lambda b, t: (0, 0)),        # w12
            pl.BlockSpec((2 * cp, 1), lambda b, t: (0, 0)),           # b12
            pl.BlockSpec((nb, cp, cp), lambda b, t: (0, 0, 0)),       # wm1
            pl.BlockSpec((nb, cp, 1), lambda b, t: (0, 0, 0)),        # bm1
            pl.BlockSpec((nb, 9, cp, cp), lambda b, t: (0, 0, 0, 0)), # wm2
            pl.BlockSpec((nb, cp, 1), lambda b, t: (0, 0, 0)),        # bm2
            pl.BlockSpec((coutp, cp), lambda b, t: (0, 0)),           # w3h
            pl.BlockSpec((coutp, cp), lambda b, t: (0, 0)),           # w3y
            pl.BlockSpec((coutp, 1), lambda b, t: (0, 0)),            # b3
            pl.BlockSpec((None, 1, span), lambda b, t: (t, 0, 0)),    # valid
            pl.BlockSpec((None, 1, span), lambda b, t: (t, 0, 0)),    # cm1
            pl.BlockSpec((None, 1, span), lambda b, t: (t, 0, 0)),    # cp1
        ],
        out_specs=pl.BlockSpec((None, coutp, L), lambda b, t: (b, 0, t)),
        compiler_params=pltpu.CompilerParams(
            dimension_semantics=("parallel", "parallel"),
            vmem_limit_bytes=vmem_limit),
    )(x_tiles, w12, b12, wm1, bm1, wm2, bm2, w3h, w3y, b3,
      valid_t, cm1_t, cp1_t)

    return out[:, :cout, :P].reshape(N, cout, H, W)


# ------------------------------ parameters ---------------------------------

def kaiming_normal(key, shape, fan_in):
    std = (2.0 / fan_in) ** 0.5
    return (std * jax.random.normal(key, shape)).astype(jnp.float32)


def make_baseconv_params(key, cin, cout, ksize):
    kw, kg, kb, km, kv = jax.random.split(key, 5)
    # Non-trivial BN stats so the BN folding + mask logic is actually tested.
    return {
        'w': kaiming_normal(kw, (cout, cin, ksize, ksize), cin * ksize * ksize),
        'bn_gamma': 1.0 + 0.2 * jax.random.normal(kg, (cout,), jnp.float32),
        'bn_beta': 0.3 * jax.random.normal(kb, (cout,), jnp.float32),
        'bn_mean': 0.3 * jax.random.normal(km, (cout,), jnp.float32),
        'bn_var': 0.5 + jax.random.uniform(kv, (cout,), jnp.float32),
    }


def make_c3_params(key, in_channels, out_channels, n=1, shortcut=True, e=0.5):
    c_ = int(out_channels * e)
    keys = jax.random.split(key, 3 + 2 * n)
    return {
        'c_': c_, 'cin': in_channels, 'cout': out_channels,
        # Bottleneck(c_, c_, shortcut): in == out channels, so add == shortcut
        'add': bool(shortcut),
        'cv1': make_baseconv_params(keys[0], in_channels, c_, 1),
        'cv2': make_baseconv_params(keys[1], in_channels, c_, 1),
        'cv3': make_baseconv_params(keys[2], 2 * c_, out_channels, 1),
        'm': [{'cv1': make_baseconv_params(keys[3 + 2 * i], c_, c_, 1),
               'cv2': make_baseconv_params(keys[4 + 2 * i], c_, c_, 3)}
              for i in range(n)],
    }


# ------------------------------ pure-JAX reference -------------------------

def _ref_baseconv(x, p):
    w, b = _fold_bn(p)
    y = jax.lax.conv_general_dilated(
        x, w, window_strides=(1, 1), padding='SAME',
        dimension_numbers=('NCHW', 'OIHW', 'NCHW'))
    y = y + b.reshape(1, -1, 1, 1)
    return y * jax.nn.sigmoid(y)


def _ref_c3(x, params):
    y1 = _ref_baseconv(x, params['cv1'])
    y2 = _ref_baseconv(x, params['cv2'])
    h = y1
    for bp in params['m']:
        u = _ref_baseconv(_ref_baseconv(h, bp['cv1']), bp['cv2'])
        h = h + u if params['add'] else u
    return _ref_baseconv(jnp.concatenate([h, y2], axis=1), params['cv3'])


# ------------------------------ main ----------------------------------------

if __name__ == "__main__":
    key = jax.random.PRNGKey(0)
    kx, kp, kp2 = jax.random.split(key, 3)

    N, C, H, W = 2, 8, 16, 16                 # NCHW, as in the PyTorch module
    x = jax.random.normal(kx, (N, C, H, W), jnp.float32)

    # --- n=1, shortcut=True (module defaults), f32 ---
    params = make_c3_params(kp, in_channels=C, out_channels=8, n=1,
                            shortcut=True, e=0.5)
    ref = _ref_c3(x, params)
    out = jax.block_until_ready(c3_forward(x, params))
    assert out.shape == (N, 8, H, W), out.shape
    err = float(jnp.max(jnp.abs(out - ref)))
    assert jnp.allclose(out, ref, atol=3e-4, rtol=3e-4), err

    # --- n=2 bottlenecks (in-kernel chain + shortcuts), f32 ---
    params2 = make_c3_params(kp2, in_channels=C, out_channels=8, n=2,
                             shortcut=True, e=0.5)
    ref2 = _ref_c3(x, params2)
    out2 = jax.block_until_ready(c3_forward(x, params2))
    err2 = float(jnp.max(jnp.abs(out2 - ref2)))
    assert jnp.allclose(out2, ref2, atol=3e-4, rtol=3e-4), err2

    # --- spatial-tiled path (>1 lane tile with halo), f32 ---
    out2t = jax.block_until_ready(c3_forward(x, params2, max_tile_lanes=128))
    err2t = float(jnp.max(jnp.abs(out2t - ref2)))
    assert jnp.allclose(out2t, ref2, atol=3e-4, rtol=3e-4), err2t

    # --- bf16 I/O + bf16 MXU operands (f32 accumulation inside) ---
    out_bf = jax.block_until_ready(c3_forward(x, params, io_dtype=jnp.bfloat16))
    rel_bf = float(jnp.max(jnp.abs(out_bf.astype(jnp.float32) - ref)
                           / (jnp.abs(ref) + 1.0)))
    assert rel_bf < 0.1, rel_bf

    print("KERNEL_OK")
</pallas_src>

<mosaic_0001>
module attributes {stable_mosaic.version = 11 : i64} {
  func.func @c3_fused_kernel(%arg0: i32, %arg1: i32, %arg2: memref<1x1x8x512xf32, #tpu.memory_space<vmem>>, %arg3: memref<16x8xf32, #tpu.memory_space<vmem>>, %arg4: memref<16x1xf32, #tpu.memory_space<vmem>>, %arg5: memref<1x8x8xf32, #tpu.memory_space<vmem>>, %arg6: memref<1x8x1xf32, #tpu.memory_space<vmem>>, %arg7: memref<1x9x8x8xf32, #tpu.memory_space<vmem>>, %arg8: memref<1x8x1xf32, #tpu.memory_space<vmem>>, %arg9: memref<8x8xf32, #tpu.memory_space<vmem>>, %arg10: memref<8x8xf32, #tpu.memory_space<vmem>>, %arg11: memref<8x1xf32, #tpu.memory_space<vmem>>, %arg12: memref<1x1x512xf32, #tpu.memory_space<vmem>>, %arg13: memref<1x1x512xf32, #tpu.memory_space<vmem>>, %arg14: memref<1x1x512xf32, #tpu.memory_space<vmem>>, %arg15: memref<1x8x256xf32, #tpu.memory_space<vmem>>) attributes {dimension_semantics = [#tpu.dimension_semantics<parallel>, #tpu.dimension_semantics<parallel>], iteration_bounds = array<i64: 2, 1>, scalar_prefetch = 0 : i64, scratch_operands = 0 : i64, tpu.core_type = #tpu.core_type<tc>, window_params = [{transform_indices = @transform_0, window_bounds = array<i64: 1, 1, 8, 512>}, {pipeline_mode = #tpu.pipeline_mode<synchronous>, transform_indices = @transform_1, window_bounds = array<i64: 16, 8>}, {pipeline_mode = #tpu.pipeline_mode<synchronous>, transform_indices = @transform_2, window_bounds = array<i64: 16, 1>}, {pipeline_mode = #tpu.pipeline_mode<synchronous>, transform_indices = @transform_3, window_bounds = array<i64: 1, 8, 8>}, {pipeline_mode = #tpu.pipeline_mode<synchronous>, transform_indices = @transform_4, window_bounds = array<i64: 1, 8, 1>}, {pipeline_mode = #tpu.pipeline_mode<synchronous>, transform_indices = @transform_5, window_bounds = array<i64: 1, 9, 8, 8>}, {pipeline_mode = #tpu.pipeline_mode<synchronous>, transform_indices = @transform_6, window_bounds = array<i64: 1, 8, 1>}, {pipeline_mode = #tpu.pipeline_mode<synchronous>, transform_indices = @transform_7, window_bounds = array<i64: 8, 8>}, {pipeline_mode = #tpu.pipeline_mode<synchronous>, transform_indices = @transform_8, window_bounds = array<i64: 8, 8>}, {pipeline_mode = #tpu.pipeline_mode<synchronous>, transform_indices = @transform_9, window_bounds = array<i64: 8, 1>}, {transform_indices = @transform_10, window_bounds = array<i64: 1, 1, 512>}, {transform_indices = @transform_11, window_bounds = array<i64: 1, 1, 512>}, {transform_indices = @transform_12, window_bounds = array<i64: 1, 1, 512>}, {transform_indices = @transform_13, window_bounds = array<i64: 1, 8, 256>}]} {
    %c0 = arith.constant 0 : index
    %c0_0 = arith.constant 0 : index
    %0 = vector.load %arg3[%c0, %c0_0] : memref<16x8xf32, #tpu.memory_space<vmem>>, vector<16x8xf32>
    %c0_1 = arith.constant 0 : index
    %c0_2 = arith.constant 0 : index
    %c0_3 = arith.constant 0 : index
    %c0_4 = arith.constant 0 : index
    %1 = vector.load %arg2[%c0_1, %c0_2, %c0_3, %c0_4] : memref<1x1x8x512xf32, #tpu.memory_space<vmem>>, vector<1x1x8x512xf32>
    %2 = vector.shape_cast %1 : vector<1x1x8x512xf32> to vector<8x512xf32>
    %cst = arith.constant dense<0.000000e+00> : vector<16x512xf32>
    %3 = tpu.matmul %0, %2, %cst {dimension_numbers = #tpu.dot_dimension_numbers<[1], [0], [0], [1], [0, 0, 1, 1], [], []>} : vector<16x8xf32>, vector<8x512xf32>, vector<16x512xf32> -> vector<16x512xf32>
    %c0_5 = arith.constant 0 : index
    %c0_6 = arith.constant 0 : index
    %4 = vector.load %arg4[%c0_5, %c0_6] : memref<16x1xf32, #tpu.memory_space<vmem>>, vector<16x1xf32>
    %5 = vector.broadcast %4 : vector<16x1xf32> to vector<16x512xf32>
    %6 = arith.addf %3, %5 : vector<16x512xf32>
    %cst_7 = arith.constant 0.000000e+00 : f32
    %7 = vector.broadcast %cst_7 : f32 to vector<16x512xf32>
    %8 = arith.subf %7, %6 : vector<16x512xf32>
    %9 = math.exp %8 : vector<16x512xf32>
    %cst_8 = arith.constant 1.000000e+00 : f32
    %10 = vector.broadcast %cst_8 : f32 to vector<16x512xf32>
    %11 = arith.addf %10, %9 : vector<16x512xf32>
    %12 = tpu.reciprocal %11 : vector<16x512xf32> -> vector<16x512xf32>
    %13 = arith.mulf %6, %12 : vector<16x512xf32>
    %14 = vector.extract_strided_slice %13 {offsets = [0, 0], sizes = [8, 512], strides = [1, 1]} : vector<16x512xf32> to vector<8x512xf32>
    %15 = vector.extract_strided_slice %13 {offsets = [8, 0], sizes = [8, 512], strides = [1, 1]} : vector<16x512xf32> to vector<8x512xf32>
    %c0_9 = arith.constant 0 : index
    %c0_10 = arith.constant 0 : index
    %c0_11 = arith.constant 0 : index
    %16 = vector.load %arg12[%c0_9, %c0_10, %c0_11] : memref<1x1x512xf32, #tpu.memory_space<vmem>>, vector<1x1x512xf32>
    %17 = vector.shape_cast %16 : vector<1x1x512xf32> to vector<1x512xf32>
    %c0_12 = arith.constant 0 : index
    %c0_13 = arith.constant 0 : index
    %c0_14 = arith.constant 0 : index
    %18 = vector.load %arg13[%c0_12, %c0_13, %c0_14] : memref<1x1x512xf32, #tpu.memory_space<vmem>>, vector<1x1x512xf32>
    %19 = vector.shape_cast %18 : vector<1x1x512xf32> to vector<1x512xf32>
    %c0_15 = arith.constant 0 : index
    %c0_16 = arith.constant 0 : index
    %c0_17 = arith.constant 0 : index
    %20 = vector.load %arg14[%c0_15, %c0_16, %c0_17] : memref<1x1x512xf32, #tpu.memory_space<vmem>>, vector<1x1x512xf32>
    %21 = vector.shape_cast %20 : vector<1x1x512xf32> to vector<1x512xf32>
    %c0_18 = arith.constant 0 : index
    %c0_19 = arith.constant 0 : index
    %c0_20 = arith.constant 0 : index
    %22 = vector.load %arg5[%c0_18, %c0_19, %c0_20] : memref<1x8x8xf32, #tpu.memory_space<vmem>>, vector<1x8x8xf32>
    %23 = vector.shape_cast %22 : vector<1x8x8xf32> to vector<8x8xf32>
    %cst_21 = arith.constant dense<0.000000e+00> : vector<8x512xf32>
    %24 = tpu.matmul %23, %14, %cst_21 {dimension_numbers = #tpu.dot_dimension_numbers<[1], [0], [0], [1], [0, 0, 1, 1], [], []>} : vector<8x8xf32>, vector<8x512xf32>, vector<8x512xf32> -> vector<8x512xf32>
    %c0_22 = arith.constant 0 : index
    %c0_23 = arith.constant 0 : index
    %c0_24 = arith.constant 0 : index
    %25 = vector.load %arg6[%c0_22, %c0_23, %c0_24] : memref<1x8x1xf32, #tpu.memory_space<vmem>>, vector<1x8x1xf32>
    %26 = vector.shape_cast %25 : vector<1x8x1xf32> to vector<8x1xf32>
    %27 = vector.broadcast %26 : vector<8x1xf32> to vector<8x512xf32>
    %28 = arith.addf %24, %27 : vector<8x512xf32>
    %cst_25 = arith.constant 0.000000e+00 : f32
    %29 = vector.broadcast %cst_25 : f32 to vector<8x512xf32>
    %30 = arith.subf %29, %28 : vector<8x512xf32>
    %31 = math.exp %30 : vector<8x512xf32>
    %cst_26 = arith.constant 1.000000e+00 : f32
    %32 = vector.broadcast %cst_26 : f32 to vector<8x512xf32>
    %33 = arith.addf %32, %31 : vector<8x512xf32>
    %34 = tpu.reciprocal %33 : vector<8x512xf32> -> vector<8x512xf32>
    %35 = arith.mulf %28, %34 : vector<8x512xf32>
    %36 = vector.broadcast %17 : vector<1x512xf32> to vector<8x512xf32>
    %37 = arith.mulf %35, %36 : vector<8x512xf32>
    %c1_i32 = arith.constant 1 : i32
    %38 = tpu.dynamic_rotate %37 by %c1_i32 dim 1 : vector<8x512xf32>, i32 -> vector<8x512xf32>
    %39 = vector.broadcast %19 : vector<1x512xf32> to vector<8x512xf32>
    %40 = arith.mulf %38, %39 : vector<8x512xf32>
    %c511_i32 = arith.constant 511 : i32
    %41 = tpu.dynamic_rotate %37 by %c511_i32 dim 1 : vector<8x512xf32>, i32 -> vector<8x512xf32>
    %42 = vector.broadcast %21 : vector<1x512xf32> to vector<8x512xf32>
    %43 = arith.mulf %41, %42 : vector<8x512xf32>
    %c0_27 = arith.constant 0 : index
    %c4 = arith.constant 4 : index
    %c0_28 = arith.constant 0 : index
    %c0_29 = arith.constant 0 : index
    %44 = vector.load %arg7[%c0_27, %c4, %c0_28, %c0_29] : memref<1x9x8x8xf32, #tpu.memory_space<vmem>>, vector<1x1x8x8xf32>
    %45 = vector.shape_cast %44 : vector<1x1x8x8xf32> to vector<8x8xf32>
    %cst_30 = arith.constant dense<0.000000e+00> : vector<8x512xf32>
    %46 = tpu.matmul %45, %37, %cst_30 {dimension_numbers = #tpu.dot_dimension_numbers<[1], [0], [0], [1], [0, 0, 1, 1], [], []>} : vector<8x8xf32>, vector<8x512xf32>, vector<8x512xf32> -> vector<8x512xf32>
    %c16_i32 = arith.constant 16 : i32
    %47 = tpu.dynamic_rotate %40 by %c16_i32 dim 1 : vector<8x512xf32>, i32 -> vector<8x512xf32>
    %c0_31 = arith.constant 0 : index
    %c0_32 = arith.constant 0 : index
    %c0_33 = arith.constant 0 : index
    %c0_34 = arith.constant 0 : index
    %48 = vector.load %arg7[%c0_31, %c0_32, %c0_33, %c0_34] : memref<1x9x8x8xf32, #tpu.memory_space<vmem>>, vector<1x1x8x8xf32>
    %49 = vector.shape_cast %48 : vector<1x1x8x8xf32> to vector<8x8xf32>
    %cst_35 = arith.constant dense<0.000000e+00> : vector<8x512xf32>
    %50 = tpu.matmul %49, %47, %cst_35 {dimension_numbers = #tpu.dot_dimension_numbers<[1], [0], [0], [1], [0, 0, 1, 1], [], []>} : vector<8x8xf32>, vector<8x512xf32>, vector<8x512xf32> -> vector<8x512xf32>
    %51 = arith.addf %46, %50 : vector<8x512xf32>
    %c16_i32_36 = arith.constant 16 : i32
    %52 = tpu.dynamic_rotate %37 by %c16_i32_36 dim 1 : vector<8x512xf32>, i32 -> vector<8x512xf32>
    %c0_37 = arith.constant 0 : index
    %c1 = arith.constant 1 : index
    %c0_38 = arith.constant 0 : index
    %c0_39 = arith.constant 0 : index
    %53 = vector.load %arg7[%c0_37, %c1, %c0_38, %c0_39] : memref<1x9x8x8xf32, #tpu.memory_space<vmem>>, vector<1x1x8x8xf32>
    %54 = vector.shape_cast %53 : vector<1x1x8x8xf32> to vector<8x8xf32>
    %cst_40 = arith.constant dense<0.000000e+00> : vector<8x512xf32>
    %55 = tpu.matmul %54, %52, %cst_40 {dimension_numbers = #tpu.dot_dimension_numbers<[1], [0], [0], [1], [0, 0, 1, 1], [], []>} : vector<8x8xf32>, vector<8x512xf32>, vector<8x512xf32> -> vector<8x512xf32>
    %56 = arith.addf %51, %55 : vector<8x512xf32>
    %c16_i32_41 = arith.constant 16 : i32
    %57 = tpu.dynamic_rotate %43 by %c16_i32_41 dim 1 : vector<8x512xf32>, i32 -> vector<8x512xf32>
    %c0_42 = arith.constant 0 : index
    %c2 = arith.constant 2 : index
    %c0_43 = arith.constant 0 : index
    %c0_44 = arith.constant 0 : index
    %58 = vector.load %arg7[%c0_42, %c2, %c0_43, %c0_44] : memref<1x9x8x8xf32, #tpu.memory_space<vmem>>, vector<1x1x8x8xf32>
    %59 = vector.shape_cast %58 : vector<1x1x8x8xf32> to vector<8x8xf32>
    %cst_45 = arith.constant dense<0.000000e+00> : vector<8x512xf32>
    %60 = tpu.matmul %59, %57, %cst_45 {dimension_numbers = #tpu.dot_dimension_numbers<[1], [0], [0], [1], [0, 0, 1, 1], [], []>} : vector<8x8xf32>, vector<8x512xf32>, vector<8x512xf32> -> vector<8x512xf32>
    %61 = arith.addf %56, %60 : vector<8x512xf32>
    %c0_46 = arith.constant 0 : index
    %c3 = arith.constant 3 : index
    %c0_47 = arith.constant 0 : index
    %c0_48 = arith.constant 0 : index
    %62 = vector.load %arg7[%c0_46, %c3, %c0_47, %c0_48] : memref<1x9x8x8xf32, #tpu.memory_space<vmem>>, vector<1x1x8x8xf32>
    %63 = vector.shape_cast %62 : vector<1x1x8x8xf32> to vector<8x8xf32>
    %cst_49 = arith.constant dense<0.000000e+00> : vector<8x512xf32>
    %64 = tpu.matmul %63, %40, %cst_49 {dimension_numbers = #tpu.dot_dimension_numbers<[1], [0], [0], [1], [0, 0, 1, 1], [], []>} : vector<8x8xf32>, vector<8x512xf32>, vector<8x512xf32> -> vector<8x512xf32>
    %65 = arith.addf %61, %64 : vector<8x512xf32>
    %c0_50 = arith.constant 0 : index
    %c5 = arith.constant 5 : index
    %c0_51 = arith.constant 0 : index
    %c0_52 = arith.constant 0 : index
    %66 = vector.load %arg7[%c0_50, %c5, %c0_51, %c0_52] : memref<1x9x8x8xf32, #tpu.memory_space<vmem>>, vector<1x1x8x8xf32>
    %67 = vector.shape_cast %66 : vector<1x1x8x8xf32> to vector<8x8xf32>
    %cst_53 = arith.constant dense<0.000000e+00> : vector<8x512xf32>
    %68 = tpu.matmul %67, %43, %cst_53 {dimension_numbers = #tpu.dot_dimension_numbers<[1], [0], [0], [1], [0, 0, 1, 1], [], []>} : vector<8x8xf32>, vector<8x512xf32>, vector<8x512xf32> -> vector<8x512xf32>
    %69 = arith.addf %65, %68 : vector<8x512xf32>
    %c496_i32 = arith.constant 496 : i32
    %70 = tpu.dynamic_rotate %40 by %c496_i32 dim 1 : vector<8x512xf32>, i32 -> vector<8x512xf32>
    %c0_54 = arith.constant 0 : index
    %c6 = arith.constant 6 : index
    %c0_55 = arith.constant 0 : index
    %c0_56 = arith.constant 0 : index
    %71 = vector.load %arg7[%c0_54, %c6, %c0_55, %c0_56] : memref<1x9x8x8xf32, #tpu.memory_space<vmem>>, vector<1x1x8x8xf32>
    %72 = vector.shape_cast %71 : vector<1x1x8x8xf32> to vector<8x8xf32>
    %cst_57 = arith.constant dense<0.000000e+00> : vector<8x512xf32>
    %73 = tpu.matmul %72, %70, %cst_57 {dimension_numbers = #tpu.dot_dimension_numbers<[1], [0], [0], [1], [0, 0, 1, 1], [], []>} : vector<8x8xf32>, vector<8x512xf32>, vector<8x512xf32> -> vector<8x512xf32>
    %74 = arith.addf %69, %73 : vector<8x512xf32>
    %c496_i32_58 = arith.constant 496 : i32
    %75 = tpu.dynamic_rotate %37 by %c496_i32_58 dim 1 : vector<8x512xf32>, i32 -> vector<8x512xf32>
    %c0_59 = arith.constant 0 : index
    %c7 = arith.constant 7 : index
    %c0_60 = arith.constant 0 : index
    %c0_61 = arith.constant 0 : index
    %76 = vector.load %arg7[%c0_59, %c7, %c0_60, %c0_61] : memref<1x9x8x8xf32, #tpu.memory_space<vmem>>, vector<1x1x8x8xf32>
    %77 = vector.shape_cast %76 : vector<1x1x8x8xf32> to vector<8x8xf32>
    %cst_62 = arith.constant dense<0.000000e+00> : vector<8x512xf32>
    %78 = tpu.matmul %77, %75, %cst_62 {dimension_numbers = #tpu.dot_dimension_numbers<[1], [0], [0], [1], [0, 0, 1, 1], [], []>} : vector<8x8xf32>, vector<8x512xf32>, vector<8x512xf32> -> vector<8x512xf32>
    %79 = arith.addf %74, %78 : vector<8x512xf32>
    %c496_i32_63 = arith.constant 496 : i32
    %80 = tpu.dynamic_rotate %43 by %c496_i32_63 dim 1 : vector<8x512xf32>, i32 -> vector<8x512xf32>
    %c0_64 = arith.constant 0 : index
    %c8 = arith.constant 8 : index
    %c0_65 = arith.constant 0 : index
    %c0_66 = arith.constant 0 : index
    %81 = vector.load %arg7[%c0_64, %c8, %c0_65, %c0_66] : memref<1x9x8x8xf32, #tpu.memory_space<vmem>>, vector<1x1x8x8xf32>
    %82 = vector.shape_cast %81 : vector<1x1x8x8xf32> to vector<8x8xf32>
    %cst_67 = arith.constant dense<0.000000e+00> : vector<8x512xf32>
    %83 = tpu.matmul %82, %80, %cst_67 {dimension_numbers = #tpu.dot_dimension_numbers<[1], [0], [0], [1], [0, 0, 1, 1], [], []>} : vector<8x8xf32>, vector<8x512xf32>, vector<8x512xf32> -> vector<8x512xf32>
    %84 = arith.addf %79, %83 : vector<8x512xf32>
    %c0_68 = arith.constant 0 : index
    %c0_69 = arith.constant 0 : index
    %c0_70 = arith.constant 0 : index
    %85 = vector.load %arg8[%c0_68, %c0_69, %c0_70] : memref<1x8x1xf32, #tpu.memory_space<vmem>>, vector<1x8x1xf32>
    %86 = vector.shape_cast %85 : vector<1x8x1xf32> to vector<8x1xf32>
    %87 = vector.broadcast %86 : vector<8x1xf32> to vector<8x512xf32>
    %88 = arith.addf %84, %87 : vector<8x512xf32>
    %cst_71 = arith.constant 0.000000e+00 : f32
    %89 = vector.broadcast %cst_71 : f32 to vector<8x512xf32>
    %90 = arith.subf %89, %88 : vector<8x512xf32>
    %91 = math.exp %90 : vector<8x512xf32>
    %cst_72 = arith.constant 1.000000e+00 : f32
    %92 = vector.broadcast %cst_72 : f32 to vector<8x512xf32>
    %93 = arith.addf %92, %91 : vector<8x512xf32>
    %94 = tpu.reciprocal %93 : vector<8x512xf32> -> vector<8x512xf32>
    %95 = arith.mulf %88, %94 : vector<8x512xf32>
    %96 = arith.addf %14, %95 : vector<8x512xf32>
    %97 = vector.extract_strided_slice %96 {offsets = [0, 128], sizes = [8, 256], strides = [1, 1]} : vector<8x512xf32> to vector<8x256xf32>
    %98 = vector.extract_strided_slice %15 {offsets = [0, 128], sizes = [8, 256], strides = [1, 1]} : vector<8x512xf32> to vector<8x256xf32>
    %c0_73 = arith.constant 0 : index
    %c0_74 = arith.constant 0 : index
    %99 = vector.load %arg9[%c0_73, %c0_74] : memref<8x8xf32, #tpu.memory_space<vmem>>, vector<8x8xf32>
    %cst_75 = arith.constant dense<0.000000e+00> : vector<8x256xf32>
    %100 = tpu.matmul %99, %97, %cst_75 {dimension_numbers = #tpu.dot_dimension_numbers<[1], [0], [0], [1], [0, 0, 1, 1], [], []>} : vector<8x8xf32>, vector<8x256xf32>, vector<8x256xf32> -> vector<8x256xf32>
    %c0_76 = arith.constant 0 : index
    %c0_77 = arith.constant 0 : index
    %101 = vector.load %arg10[%c0_76, %c0_77] : memref<8x8xf32, #tpu.memory_space<vmem>>, vector<8x8xf32>
    %cst_78 = arith.constant dense<0.000000e+00> : vector<8x256xf32>
    %102 = tpu.matmul %101, %98, %cst_78 {dimension_numbers = #tpu.dot_dimension_numbers<[1], [0], [0], [1], [0, 0, 1, 1], [], []>} : vector<8x8xf32>, vector<8x256xf32>, vector<8x256xf32> -> vector<8x256xf32>
    %103 = arith.addf %100, %102 : vector<8x256xf32>
    %c0_79 = arith.constant 0 : index
    %c0_80 = arith.constant 0 : index
    %104 = vector.load %arg11[%c0_79, %c0_80] : memref<8x1xf32, #tpu.memory_space<vmem>>, vector<8x1xf32>
    %105 = vector.broadcast %104 : vector<8x1xf32> to vector<8x256xf32>
    %106 = arith.addf %103, %105 : vector<8x256xf32>
    %cst_81 = arith.constant 0.000000e+00 : f32
    %107 = vector.broadcast %cst_81 : f32 to vector<8x256xf32>
    %108 = arith.subf %107, %106 : vector<8x256xf32>
    %109 = math.exp %108 : vector<8x256xf32>
    %cst_82 = arith.constant 1.000000e+00 : f32
    %110 = vector.broadcast %cst_82 : f32 to vector<8x256xf32>
    %111 = arith.addf %110, %109 : vector<8x256xf32>
    %112 = tpu.reciprocal %111 : vector<8x256xf32> -> vector<8x256xf32>
    %113 = arith.mulf %106, %112 : vector<8x256xf32>
    %c0_83 = arith.constant 0 : index
    %c0_84 = arith.constant 0 : index
    %c0_85 = arith.constant 0 : index
    %114 = vector.load %arg15[%c0_83, %c0_84, %c0_85] : memref<1x8x256xf32, #tpu.memory_space<vmem>>, vector<1x8x256xf32>
    %115 = vector.shape_cast %114 : vector<1x8x256xf32> to vector<8x256xf32>
    %116 = vector.shape_cast %113 : vector<8x256xf32> to vector<1x8x256xf32>
    tpu.vector_store %arg15[%c0_83, %c0_84, %c0_85], %116 {strides = array<i32>} : memref<1x8x256xf32, #tpu.memory_space<vmem>>, vector<1x8x256xf32>,
    return
  }
  func.func @transform_0(%arg0: i32, %arg1: i32) -> (i32, i32, i32, i32) {
    %c0_i32 = arith.constant 0 : i32
    %c0_i32_0 = arith.constant 0 : i32
    %c0_i32_1 = arith.constant 0 : i32
    return %arg0, %arg1, %c0_i32, %c0_i32_0 : i32, i32, i32, i32
  }
  func.func @transform_1(%arg0: i32, %arg1: i32) -> (i32, i32) {
    %c0_i32 = arith.constant 0 : i32
    %c0_i32_0 = arith.constant 0 : i32
    %c0_i32_1 = arith.constant 0 : i32
    return %c0_i32, %c0_i32_0 : i32, i32
  }
  func.func @transform_2(%arg0: i32, %arg1: i32) -> (i32, i32) {
    %c0_i32 = arith.constant 0 : i32
    %c0_i32_0 = arith.constant 0 : i32
    %c0_i32_1 = arith.constant 0 : i32
    return %c0_i32, %c0_i32_0 : i32, i32
  }
  func.func @transform_3(%arg0: i32, %arg1: i32) -> (i32, i32, i32) {
    %c0_i32 = arith.constant 0 : i32
    %c0_i32_0 = arith.constant 0 : i32
    %c0_i32_1 = arith.constant 0 : i32
    %c0_i32_2 = arith.constant 0 : i32
    return %c0_i32, %c0_i32_0, %c0_i32_1 : i32, i32, i32
  }
  func.func @transform_4(%arg0: i32, %arg1: i32) -> (i32, i32, i32) {
    %c0_i32 = arith.constant 0 : i32
    %c0_i32_0 = arith.constant 0 : i32
    %c0_i32_1 = arith.constant 0 : i32
    %c0_i32_2 = arith.constant 0 : i32
    return %c0_i32, %c0_i32_0, %c0_i32_1 : i32, i32, i32
  }
  func.func @transform_5(%arg0: i32, %arg1: i32) -> (i32, i32, i32, i32) {
    %c0_i32 = arith.constant 0 : i32
    %c0_i32_0 = arith.constant 0 : i32
    %c0_i32_1 = arith.constant 0 : i32
    %c0_i32_2 = arith.constant 0 : i32
    %c0_i32_3 = arith.constant 0 : i32
    return %c0_i32, %c0_i32_0, %c0_i32_1, %c0_i32_2 : i32, i32, i32, i32
  }
  func.func @transform_6(%arg0: i32, %arg1: i32) -> (i32, i32, i32) {
    %c0_i32 = arith.constant 0 : i32
    %c0_i32_0 = arith.constant 0 : i32
    %c0_i32_1 = arith.constant 0 : i32
    %c0_i32_2 = arith.constant 0 : i32
    return %c0_i32, %c0_i32_0, %c0_i32_1 : i32, i32, i32
  }
  func.func @transform_7(%arg0: i32, %arg1: i32) -> (i32, i32) {
    %c0_i32 = arith.constant 0 : i32
    %c0_i32_0 = arith.constant 0 : i32
    %c0_i32_1 = arith.constant 0 : i32
    return %c0_i32, %c0_i32_0 : i32, i32
  }
  func.func @transform_8(%arg0: i32, %arg1: i32) -> (i32, i32) {
    %c0_i32 = arith.constant 0 : i32
    %c0_i32_0 = arith.constant 0 : i32
    %c0_i32_1 = arith.constant 0 : i32
    return %c0_i32, %c0_i32_0 : i32, i32
  }
  func.func @transform_9(%arg0: i32, %arg1: i32) -> (i32, i32) {
    %c0_i32 = arith.constant 0 : i32
    %c0_i32_0 = arith.constant 0 : i32
    %c0_i32_1 = arith.constant 0 : i32
    return %c0_i32, %c0_i32_0 : i32, i32
  }
  func.func @transform_10(%arg0: i32, %arg1: i32) -> (i32, i32, i32) {
    %c0_i32 = arith.constant 0 : i32
    %c0_i32_0 = arith.constant 0 : i32
    %c0_i32_1 = arith.constant 0 : i32
    return %arg1, %c0_i32, %c0_i32_0 : i32, i32, i32
  }
  func.func @transform_11(%arg0: i32, %arg1: i32) -> (i32, i32, i32) {
    %c0_i32 = arith.constant 0 : i32
    %c0_i32_0 = arith.constant 0 : i32
    %c0_i32_1 = arith.constant 0 : i32
    return %arg1, %c0_i32, %c0_i32_0 : i32, i32, i32
  }
  func.func @transform_12(%arg0: i32, %arg1: i32) -> (i32, i32, i32) {
    %c0_i32 = arith.constant 0 : i32
    %c0_i32_0 = arith.constant 0 : i32
    %c0_i32_1 = arith.constant 0 : i32
    return %arg1, %c0_i32, %c0_i32_0 : i32, i32, i32
  }
  func.func @transform_13(%arg0: i32, %arg1: i32) -> (i32, i32, i32) {
    %c0_i32 = arith.constant 0 : i32
    %c0_i32_0 = arith.constant 0 : i32
    return %arg0, %c0_i32, %arg1 : i32, i32, i32
  }
}

</mosaic_0001>

<bundles_post_ra>
// kernel: tpu_custom_call.1
= control target key start
LH: loop header
LB: loop body
LE: loop exit
PB: predicated region body
PF: predicated region fallthrough
CT: control target
= control target key end

     0   :  { %s3487_s0 = inlined_call_operand.vmem [shape: f32[2,1,8,512], index: 0, kind: input, shape index: {}]   ;;  %s3488_s1 = inlined_call_operand.vmem [shape: f32[16,8], index: 1, kind: input, shape index: {}]   ;;  %s3489_s2 = inlined_call_operand.vmem [shape: f32[16,1], index: 2, kind: input, shape index: {}]   ;;  %s3490_s3 = inlined_call_operand.vmem [shape: f32[1,8,8], index: 3, kind: input, shape index: {}]   ;;  %s3491_s4 = inlined_call_operand.vmem [shape: f32[1,8,1], index: 4, kind: input, shape index: {}]   ;;  %s3492_s5 = inlined_call_operand.vmem [shape: f32[1,9,8,8], index: 5, kind: input, shape index: {}]   ;;  %s3493_s6 = inlined_call_operand.vmem [shape: f32[1,8,1], index: 6, kind: input, shape index: {}]   ;;  %s3494_s7 = inlined_call_operand.vmem [shape: f32[8,8], index: 7, kind: input, shape index: {}]   ;;  %s3495_s8 = inlined_call_operand.vmem [shape: f32[8,8], index: 8, kind: input, shape index: {}]   ;;  %s3496_s9 = inlined_call_operand.vmem [shape: f32[8,1], index: 9, kind: input, shape index: {}]   ;;  %s3497_s10 = inlined_call_operand.vmem [shape: f32[1,1,512], index: 10, kind: input, shape index: {}]   ;;  %s3498_s11 = inlined_call_operand.vmem [shape: f32[1,1,512], index: 11, kind: input, shape index: {}]   ;;  %s3499_s12 = inlined_call_operand.vmem [shape: f32[1,1,512], index: 12, kind: input, shape index: {}]   ;;  %s3500_s13 = inlined_call_operand.hbm [shape: f32[2,8,256], index: 13, kind: output, shape index: {}]  }
   0x1   :  { %3503 = sst [smem:[#allocation8_spill]] %s3487_s0 }
   0x2   :  { %18 = vsyncpa [#allocation3], 0 }
   0x3   :  { %20 = vsyncpa [#allocation3 + $0x1], 0  ;;  %s3073_s25 = smov 0   ;;  %s3075_s26 = smov 0  }
   0x4   :  { %s3077_s27 = smov 0   ;;  %s3079_s28 = smov 0  }
   0x5   :  { %s3081_s29 = smov 0   ;;  %s3083_s30 = smov 0  }
   0x6 LB: > { %3504 = sst [smem:[#allocation5_spill]] %s2990_s29  ;;  %s2741_s14 = sadd.s32 4294967295, %s2994_s30   ;;  %s2994_s30 = sphi %s3083_s30, %s26_s30   ;;  %s2990_s29 = sphi %s3081_s29, %s3512_s29   ;;  %s2986_s28 = sphi %s3079_s28, %s3511_s28   ;;  %s2982_s27 = sphi %s3077_s27, %s3515_s27   ;;  %s2978_s26 = sphi %s3075_s26, %s3514_s26   ;;  %s2974_s25 = sphi %s3073_s25, %s3513_s25  }
   0x7   : > { %s2742_s15 = sadd.s32 4294967294, %s2994_s30   ;;  %s38_s16 = sadd.s32 1, %s2990_s29 }
   0x8   : > { %s342_s17 = sadd.s32 1, %s2982_s27  ;;  %p40_p0 = scmp.ge.s32.totalorder %s38_s16, 2 }
   0x9   : > { %p352_p1 = scmp.ne.s32.totalorder %s2982_s27, %s2978_s26  ;;  %p353_p2 = scmp.eq.s32.totalorder %s2741_s14, 1 }
   0xa   : > { %p358_p3 = scmp.ne.s32.totalorder %s2978_s26, %s2974_s25  ;;  %s3517_s16 = smov (%p40_p0, %s38_s16), 0 }
   0xb   : > { %3505 = sst [smem:[#allocation6_spill]] %s3517_s16  ;;  %p3113_p4 = por %p353_p2, %p352_p1 }
   0xc   : > { %p359_p5 = scmp.eq.s32.totalorder %s2742_s15, 1  ;;  %s337_s19 = ssub.s32 %s2990_s29, %s3517_s16 }
   0xd   : > { %p2748_p6 = scmp.ge.s32.totalorder %s2994_s30, 1  ;;  %p340_p7 = scmp.eq.s32.totalorder %s337_s19, 0 }
   0xe   : > { %p3120_p8 = por %p359_p5, %p358_p3  ;;  %p437_p9 = scmp.lt.s32.totalorder %s2994_s30, 3 }
   0xf   : > { %s3126_s21 = scalar_select %p340_p7, %s2982_s27, %s342_s17  }
  0x10   : > { %p438_p10 = pnand %p2748_p6, %p437_p9 }
  0x11   : > { %3508 = sst [smem:[#allocation7_spill]] %s3126_s21  ;;  %p497_p11 = scmp.lt.s32.totalorder (!%p438_p10), %s2986_s28, 1  ;;  %v2996_v0 = vmov (!%p438_p10), 0.0   ;;  %v525_v1 = vld [vmem:[%s3489_s2] sm:$0xff] (!%p438_p10)  ;;  %v2997_v2 = vmov (!%p438_p10), 0   ;;  %vm537_vm0 = vcmask (!%p438_p10), 64512  }
  0x12   : > { %441 = sbr.rel (%p438_p10) target bundleno = 1313 (0x521), region = 72  ;;  %608 = vmatprep.mubr.f32.mxu0 (!%p438_p10), %v2996_v0  ;;  %614 = vmatprep.mubr.f32.mxu1 (!%p438_p10), %v2996_v0  ;;  %s3509_s0 = sld [smem:[#allocation8_spill]] (!%p438_p10)  ;;  %v519_v3 = vld [vmem:[%s3488_s1] sm:$0xff] (!%p438_p10)  ;;  %v520_v6 = vld [vmem:[%s3488_s1 + $0x8] sm:$0xff] (!%p438_p10) }
  0x13   : > { %2858 = vset.pattern.permute.xlu0 (!%p438_p10), %v2997_v2  ;;  %2859 = vset.pattern.permute.xlu1 (!%p438_p10), %v2997_v2  ;;  %v736_v9 = vld [vmem:[%s3491_s4] sm:$0xff] (!%p438_p10)  ;;  %s2998_s15 = smov (!%p438_p10), 1   ;;  %s2999_s17 = smov (!%p438_p10), 127  }
  0x14   : > { %529 = vperm.xlu0 (!%p438_p10), %2858, %v525_v1   ;;  %v735_v43 = vld [vmem:[%s3490_s3] sm:$0xff] (!%p438_p10)  ;;  %s3001_s16 = smov (!%p438_p10), 112   ;;  %s494_s29 = sand.u32 (!%p438_p10), 1, %s2978_s26  }
  0x15   : > { %s2792_s21 = sshll.u32 (!%p438_p10), %s2986_s28, 8  ;;  %s2601_s23 = scalar_lea.sflag (!%p438_p10), [#allocation3], %s494_s29 }
  0x16   : > { %s3440_s22 = scalar_lea.hbm (!%p438_p10), %s3500_s13, %s2792_s21 }
  0x18   : > { %739 = vperm.xlu0 (!%p438_p10), %2858, %v736_v9  }
  0x19   : > { %s498_s24 = scalar_select %p497_p11, %s2986_s28, 1 }
  0x1b   : > { %s2791_s14 = sshll.u32 %s498_s24, 5  ;;  %s3002_s24 = smov [#allocation2]  }
  0x1c   : > { %s505_s19 = scalar_lea.vmem %s3509_s0, %s2791_s14 }
  0x1d   : > { %v522_v4 = vld [vmem:[%s505_s19 + $0x8] sm:$0xff]  ;;  %v521_v5 = vld [vmem:[%s505_s19] sm:$0xff]  ;;  %v524_v7 = vld [vmem:[%s505_s19 + $0x18] sm:$0xff] }
  0x1e   : > { %544 = vmatprep.subr.mxu0 %v522_v4  ;;  %2793 = vmatprep.subr.mxu1 %v522_v4  ;;  %v523_v8 = vld [vmem:[%s505_s19 + $0x10] sm:$0xff]  ;;  %s3000_s19 = smov 16  }
  0x1f   : > { %545 = vmatpush1.msra.mxu0 %v521_v5  ;;  %2794 = vmatpush1.msra.mxu1 %v521_v5 }
  0x20   : > { %2752 = vmatmul.mubr.msk.f32.vlgmr.msra.gmra.mrb[0].mxu0 %vm537_vm0, %v519_v3  ;;  %2753 = vmatmul.mubr.msk.f32.vlgmr.msra.gmra.mrb[0].mxu1 %vm537_vm0, %v520_v6 }
  0x21   : > { %620 = vmatprep.subr.mxu1 %v524_v7  ;;  %684 = vmatprep.mubr.f32.mxu1 %v2996_v0 }
  0x22   : > { %621 = vmatpush1.msra.mxu1 %v523_v8  ;;  %809 = vmatprep.mubr.f32.mxu0 %v2996_v0 }
  0x24   : > { %2754 = vmatmul.mubr.msk.f32.vlgmr.msra.gmra.mrb[2].mxu1 %vm537_vm0, %v519_v3  ;;  %v912_v3 = vlaneseq }
  0x25   : > { %690 = vmatprep.mubr.f32.mxu1 %v2996_v0 }
  0x26   : > { %v913_v8 = vshrl.u32 %v912_v3, 7 }
  0x28   : > { %2755 = vmatmul.mubr.msk.f32.gmra.mrb[4].mxu1 %vm537_vm0, %v520_v6 }
  0x29   : > { %880 = vmatprep.mubr.f32.mxu1 %v2996_v0 }
  0x93   : > { %v530_v10 = vpop.permute.xlu0 %529 }
  0x97   : > { %v740_v48 = vpop.permute.xlu0 %739 }
  0xf3   : > { %v610_v11 = vpop.f32.mrb[0].mxu0  ;;  %v616_v12 = vpop.f32.mrb[0].mxu1 }
  0xf4   : > { %v611_v13 = vadd.f32 %v610_v11, %v530_v10  ;;  %v612_v14 = vpop.f32.mrb[1].mxu0  ;;  %v3155_v15 = vpop.f32.mrb[1].mxu1  ;;  %v3172_v12 = vsub.s32 0, %v913_v8 }
  0xf5   : > { %v613_v16 = vadd.f32 %v612_v14, %v530_v10  ;;  %v3177_v14 = vsub.s32 1, %v913_v8 }
  0xf6   : > { %v696_v17 = vsub.f32 0.0, %v611_v13 }
  0xf7   : > { %v697_v18 = vsub.f32 0.0, %v613_v16  ;;  %v686_v19 = vpop.f32.mrb[2].mxu1 }
  0xf8   : > { %v702_v20 = vmul.f32 1.442695, %v696_v17  ;;  %v687_v21 = vadd.f32 %v686_v19, %v530_v10  ;;  %v688_v22 = vpop.f32.mrb[3].mxu1  ;;  %v3180_v17 = vsub.s32 2, %v913_v8 }
  0xf9   : > { %v704_v23 = vmul.f32 1.442695, %v697_v18  ;;  %v689_v24 = vadd.f32 %v688_v22, %v530_v10 }
  0xfa   : > { %2860 = vpow2.f32 %v702_v20  ;;  %v698_v25 = vsub.f32 0.0, %v687_v21 }
  0xfb   : > { %2862 = vpow2.f32 %v704_v23  ;;  %v699_v26 = vsub.f32 0.0, %v689_v24  ;;  %v3157_v27 = vpop.f32.mrb[4].mxu1 }
  0xfc   : > { %v706_v28 = vmul.f32 1.442695, %v698_v25  ;;  %v694_v29 = vpop.f32.mrb[5].mxu1  ;;  %v3186_v25 = vsub.s32 3, %v913_v8 }
  0xfd   : > { %v708_v30 = vmul.f32 1.442695, %v699_v26 }
  0xfe   : > { %2864 = vpow2.f32 %v706_v28 }
  0xff   : > { %2866 = vpow2.f32 %v708_v30 }
 0x104   : > { %v2861_v31 = vpop.eup %2860 }
 0x105   : > { %v2863_v32 = vpop.eup %2862  ;;  %v714_v33 = vadd.f32 1.0, %v2861_v31 }
 0x106   : > { %v715_v34 = vadd.f32 1.0, %v2863_v32 }
 0x107   : > { %2868 = vrcp.f32 %v714_v33 }
 0x108   : > { %v2865_v35 = vpop.eup %2864  ;;  %2870 = vrcp.f32 %v715_v34 }
 0x109   : > { %v2867_v36 = vpop.eup %2866  ;;  %v716_v37 = vadd.f32 1.0, %v2865_v35  ;;  %v3211_v35 = vand.u32 127, %v912_v3 }
 0x10a   : > { %v717_v38 = vadd.f32 1.0, %v2867_v36  ;;  %v733_v36 = vld [vmem:[%s3498_s11] sm:$0xf] }
 0x10b   : > { %2872 = vrcp.f32 %v716_v37  ;;  %vm946_vm1 = vcmp.lt.s32.totalorder %v3211_v35, 1  ;;  %vm984_vm2 = vcmp.lt.s32.totalorder %v3211_v35, 127  ;;  %vm1024_vm3 = vcmp.lt.s32.totalorder %v3211_v35, 16 }
 0x10c   : > { %2874 = vrcp.f32 %v717_v38  ;;  %v959_v38 = vrot.slane %v733_v36, %v3177_v14  ;;  %vm1936_vm4 = vcmp.lt.s32.totalorder %v3211_v35, 112 }
 0x111   : > { %v2869_v39 = vpop.eup %2868 }
 0x112   : > { %v2871_v40 = vpop.eup %2870  ;;  %v726_v42 = vmul.f32 %v2869_v39, %v611_v13  ;;  %v732_v13 = vld [vmem:[%s3497_s10] sm:$0xf]  ;;  %v963_v39 = vrot.slane %v733_v36, %v3180_v17 }
 0x113   : > { %v3159_v41 = vmul.f32 %v2871_v40, %v613_v16  ;;  %v915_v16 = vrot.slane %v732_v13, %v3172_v12  ;;  %v927_v33 = vrot.slane %v732_v13, %v3186_v25 }
 0x115   : > { %v2873_v44 = vpop.eup %2872  ;;  %745 = vmatprep.subr.mxu0 %v3159_v41 }
 0x116   : > { %v2875_v45 = vpop.eup %2874  ;;  %746 = vmatpush1.msra.mxu0 %v726_v42  ;;  %v3166_v47 = vmul.f32 %v2873_v44, %v687_v21  ;;  %v919_v21 = vrot.slane %v732_v13, %v3177_v14 }
 0x117   : > { %v729_v46 = vmul.f32 %v2875_v45, %v689_v24  ;;  %2756 = vmatmul.mubr.msk.f32.vlgmr.msra.gmra.mrb[2].mxu0 %vm537_vm0, %v735_v43  ;;  %v923_v24 = vrot.slane %v732_v13, %v3180_v17 }
 0x118   : > { %1097 = vmatprep.mubr.f32.mxu0 %v2996_v0 }
 0x119   : > { %816 = vmatprep.subr.mxu1 %v729_v46 }
 0x11a   : > { %817 = vmatpush1.msra.mxu1 %v3166_v47 }
 0x11b   : > { %2757 = vmatmul.mubr.msk.f32.vlgmr.msra.gmra.mrb[6].mxu1 %vm537_vm0, %v735_v43 }
 0x11c   : > { %1167 = vmatprep.mubr.f32.mxu1 %v2996_v0 }
 0x1ea   : > { %v811_v49 = vpop.f32.mrb[2].mxu0 }
 0x1eb   : > { %v812_v50 = vadd.f32 %v811_v49, %v740_v48  ;;  %v813_v51 = vpop.f32.mrb[3].mxu0  ;;  %v967_v49 = vrot.slane %v733_v36, %v3186_v25 }
 0x1ec   : > { %v814_v52 = vadd.f32 %v813_v51, %v740_v48 }
 0x1ed   : > { %v887_v53 = vsub.f32 0.0, %v812_v50 }
 0x1ee   : > { %v888_v54 = vsub.f32 0.0, %v814_v52  ;;  %v882_v55 = vpop.f32.mrb[6].mxu1 }
 0x1ef   : > { %v891_v56 = vmul.f32 1.442695, %v887_v53  ;;  %v883_v57 = vadd.f32 %v882_v55, %v740_v48  ;;  %v884_v58 = vpop.f32.mrb[7].mxu1 }
 0x1f0   : > { %v893_v59 = vmul.f32 1.442695, %v888_v54  ;;  %v885_v60 = vadd.f32 %v884_v58, %v740_v48  ;;  %v955_v48 = vrot.slane %v733_v36, %v3172_v12  ;;  %v2758_v36 = vld [vmem:[%s3492_s5 + $0x20] sm:$0xff] }
 0x1f1   : > { %2876 = vpow2.f32 %v891_v56  ;;  %v889_v61 = vsub.f32 0.0, %v883_v57 }
 0x1f2   : > { %2878 = vpow2.f32 %v893_v59  ;;  %v890_v62 = vsub.f32 0.0, %v885_v60 }
 0x1f3   : > { %v895_v63 = vmul.f32 1.442695, %v889_v61 }
 0x1f4   : > { %v897_v1 = vmul.f32 1.442695, %v890_v62 }
 0x1f5   : > { %2880 = vpow2.f32 %v895_v63 }
 0x1f6   : > { %2882 = vpow2.f32 %v897_v1 }
 0x1fb   : > { %v2877_v2 = vpop.eup %2876 }
 0x1fc   : > { %v2879_v4 = vpop.eup %2878  ;;  %v899_v5 = vadd.f32 1.0, %v2877_v2 }
 0x1fd   : > { %v900_v6 = vadd.f32 1.0, %v2879_v4 }
 0x1fe   : > { %2884 = vrcp.f32 %v899_v5 }
 0x1ff   : > { %v2881_v7 = vpop.eup %2880  ;;  %2886 = vrcp.f32 %v900_v6 }
 0x200   : > { %v2883_v9 = vpop.eup %2882  ;;  %v901_v10 = vadd.f32 1.0, %v2881_v7 }
 0x201   : > { %v902_v11 = vadd.f32 1.0, %v2883_v9  ;;  %v526_v9 = vld [vmem:[%s3489_s2 + $0x8] sm:$0xff] }
 0x202   : > { %2888 = vrcp.f32 %v901_v10  ;;  %v2578_v10 = vld [vmem:[%s3496_s9] sm:$0xff] }
 0x203   : > { %2890 = vrcp.f32 %v902_v11  ;;  %v2406_v11 = vld [vmem:[%s3493_s6] sm:$0xff] }
 0x208   : > { %v2885_v18 = vpop.eup %2884 }
 0x209   : > { %v2887_v19 = vpop.eup %2886  ;;  %v907_v20 = vmul.f32 %v2885_v18, %v812_v50  ;;  %v734_v50 = vld [vmem:[%s3499_s12] sm:$0xf] }
 0x20a   : > { %v908_v23 = vmul.f32 %v2887_v19, %v814_v52  ;;  %v997_v58 = vrot.slane %v734_v50, %v3177_v14  ;;  %v1001_v3 = vrot.slane %v734_v50, %v3180_v17  ;;  %v1005_v4 = vrot.slane %v734_v50, %v3186_v25  ;;  %v1029_v25 = vld [vmem:[%s3492_s5] sm:$0xff] }
 0x20b   : > { %v3183_v22 = vmul.f32 %v915_v16, %v907_v20 }
 0x20c   : > { %v2889_v26 = vpop.eup %2888  ;;  %v3189_v30 = vmul.f32 %v919_v21, %v908_v23 }
 0x20d   : > { %v2891_v28 = vpop.eup %2890  ;;  %v909_v29 = vmul.f32 %v2889_v26, %v883_v57  ;;  %936 = vrot.lane.b32.xlu1 %v3183_v22, %s2998_s15  ;;  %v993_v57 = vrot.slane %v734_v50, %v3172_v12 }
 0x20e   : > { %v910_v32 = vmul.f32 %v2891_v28, %v885_v60 }
 0x20f   : > { %v3191_v31 = vmul.f32 %v923_v24, %v909_v29 }
 0x210   : > { %v3196_v34 = vmul.f32 %v927_v33, %v910_v32 }
 0x211   : > { %940 = vrot.lane.b32.xlu0 %v3191_v31, %s2998_s15  ;;  %938 = vrot.lane.b32.xlu1 %v3189_v30, %s2998_s15 }
 0x215   : > { %976 = vrot.lane.b32.xlu0 %v3183_v22, %s2999_s17  ;;  %942 = vrot.lane.b32.xlu1 %v3196_v34, %s2998_s15 }
 0x219   : > { %980 = vrot.lane.b32.xlu0 %v3191_v31, %s2999_s17  ;;  %978 = vrot.lane.b32.xlu1 %v3189_v30, %s2999_s17 }
 0x21d   : > { %1316 = vrot.lane.b32.xlu0 %v3183_v22, %s3000_s19  ;;  %982 = vrot.lane.b32.xlu1 %v3196_v34, %s2999_s17 }
 0x221   : > { %1320 = vrot.lane.b32.xlu0 %v3191_v31, %s3000_s19  ;;  %1318 = vrot.lane.b32.xlu1 %v3189_v30, %s3000_s19 }
 0x225   : > { %1322 = vrot.lane.b32.xlu1 %v3196_v34, %s3000_s19 }
 0x27f   : > { %v937_v37 = vpop.permute.xlu1 %936 }
 0x283   : > { %v941_v40 = vpop.permute.xlu0 %940  ;;  %v939_v42 = vpop.permute.xlu1 %938 }
 0x284   : > { %v948_v43 = vsel %vm946_vm1, %v939_v42, %v941_v40  ;;  %v949_v44 = vsel %vm946_vm1, %v937_v37, %v939_v42 }
 0x285   : > { %v3223_v45 = vmul.f32 %v959_v38, %v949_v44  ;;  %v3225_v46 = vmul.f32 %v963_v39, %v948_v43  ;;  %v2763_v38 = vld [vmem:[%s3492_s5 + $0x8] sm:$0xff] }
 0x287   : > { %v977_v51 = vpop.permute.xlu0 %976  ;;  %1018 = vrot.lane.b32.xlu1 %v3223_v45, %s3000_s19  ;;  %1020 = vrot.lane.b32.xlu0 %v3225_v46, %s3000_s19  ;;  %v943_v52 = vpop.permute.xlu1 %942 }
 0x288   : > { %v947_v53 = vsel %vm946_vm1, %v941_v40, %v943_v52  ;;  %v950_v54 = vsel %vm946_vm1, %v943_v52, %v937_v37 }
 0x289   : > { %v3241_v55 = vmul.f32 %v955_v48, %v950_v54  ;;  %v3243_v56 = vmul.f32 %v967_v49, %v947_v53  ;;  %v2766_v48 = vld [vmem:[%s3492_s5 + $0x10] sm:$0xff] }
 0x28b   : > { %v981_v59 = vpop.permute.xlu0 %980  ;;  %1016 = vrot.lane.b32.xlu0 %v3241_v55, %s3000_s19  ;;  %1022 = vrot.lane.b32.xlu1 %v3243_v56, %s3000_s19  ;;  %v979_v60 = vpop.permute.xlu1 %978 }
 0x28c   : > { %v986_v61 = vsel %vm984_vm2, %v979_v60, %v981_v59  ;;  %v987_v62 = vsel %vm984_vm2, %v977_v51, %v979_v60 }
 0x28d   : > { %v3255_v63 = vmul.f32 %v993_v57, %v987_v62  ;;  %v3257_v1 = vmul.f32 %v997_v58, %v986_v61 }
 0x28f   : > { %1475 = vrot.lane.b32.xlu0 %v3255_v63, %s3000_s19  ;;  %1477 = vrot.lane.b32.xlu1 %v3257_v1, %s3000_s19  ;;  %v983_v2 = vpop.permute.xlu1 %982  ;;  %v1317_v12 = vpop.permute.xlu0 %1316 }
 0x290   : > { %v985_v5 = vsel %vm984_vm2, %v981_v59, %v983_v2  ;;  %v988_v6 = vsel %vm984_vm2, %v983_v2, %v977_v51  ;;  %v2769_v51 = vld [vmem:[%s3492_s5 + $0x18] sm:$0xff]  ;;  %v2775_v59 = vld [vmem:[%s3492_s5 + $0x30] sm:$0xff] }
 0x291   : > { %v3271_v7 = vmul.f32 %v1001_v3, %v985_v5  ;;  %v3273_v8 = vmul.f32 %v1005_v4, %v988_v6  ;;  %v2778_v2 = vld [vmem:[%s3492_s5 + $0x38] sm:$0xff] }
 0x293   : > { %1932 = vrot.lane.b32.xlu0 %v3225_v46, %s3001_s16  ;;  %1930 = vrot.lane.b32.xlu1 %v3223_v45, %s3001_s16  ;;  %v1319_v13 = vpop.permute.xlu1 %1318  ;;  %v1321_v14 = vpop.permute.xlu0 %1320 }
 0x294   : > { %v1326_v32 = vsel %vm1024_vm3, %v1317_v12, %v1319_v13 }
 0x297   : > { %1481 = vrot.lane.b32.xlu1 %v3273_v8, %s3000_s19  ;;  %1479 = vrot.lane.b32.xlu0 %v3271_v7, %s3000_s19  ;;  %v1323_v16 = vpop.permute.xlu1 %1322 }
 0x298   : > { %v1324_v33 = vsel %vm1024_vm3, %v1321_v14, %v1323_v16 }
 0x29b   : > { %2090 = vrot.lane.b32.xlu1 %v3189_v30, %s3001_s16  ;;  %2088 = vrot.lane.b32.xlu0 %v3183_v22, %s3001_s16 }
 0x29f   : > { %2094 = vrot.lane.b32.xlu1 %v3196_v34, %s3001_s16  ;;  %2092 = vrot.lane.b32.xlu0 %v3191_v31, %s3001_s16 }
 0x2a3   : > { %1934 = vrot.lane.b32.xlu1 %v3243_v56, %s3001_s16  ;;  %1928 = vrot.lane.b32.xlu0 %v3241_v55, %s3001_s16 }
 0x2a7   : > { %2249 = vrot.lane.b32.xlu1 %v3257_v1, %s3001_s16  ;;  %2247 = vrot.lane.b32.xlu0 %v3255_v63, %s3001_s16 }
 0x2ab   : > { %2253 = vrot.lane.b32.xlu1 %v3273_v8, %s3001_s16  ;;  %2251 = vrot.lane.b32.xlu0 %v3271_v7, %s3001_s16  ;;  %s2749_s16 = sshll.u32 %s494_s29, 4 }
 0x2ac   : > { %s496_s14 = scalar_lea.vmem [#allocation2], %s2749_s16  ;;  %s2920_s16 = sshll.u32 %s3002_s24, 4  ;;  %s2921_s16 = int_to_ptr.vmem [resolvable:$false] %s2920_s16 }
 0x2ad   : > { %s2617_s15 = sshll.u32 %s496_s14, 4  ;;  %s2922_s0 = scalar_lea.vmem %s2921_s16, 512  ;;  %s3442_s15 = int_to_ptr.vmem [resolvable:$true] %s2617_s15 }
 0x2ae   : > { %s2916_s28 = scalar_lea.vmem %s3442_s15, 256  ;;  %p2923_p1 = scmp.lt.s32.totalorder %s3442_s15, %s2921_s16 }
 0x2af   : > { %534 = vperm.xlu0 %2858, %v526_v9   ;;  %2409 = vperm.xlu1 %2859, %v2406_v11   ;;  %p2917_p12 = scmp.ne.s32.totalorder %s3442_s15, %s2916_s28  ;;  %p2924_p2 = scmp.lt.s32.totalorder %s2922_s0, %s2916_s28 }
 0x2b1   : > { %p2918_p13 = pnand %p2917_p12, %p3113_p4  ;;  %p2925_p3 = por %p2924_p2, %p2923_p1 }
 0x2b3   : > { %2581 = vperm.xlu0 %2858, %v2578_v10   ;;  %v2781_v10 = vld [vmem:[%s3492_s5 + $0x40] sm:$0xff]  ;;  %p2919_p0 = pneg %p2918_p13 }
 0x2b5   : > { %p2926_p5 = pnand %p2925_p3, %p2919_p0 }
 0x2f9   : > { %v1021_v17 = vpop.permute.xlu0 %1020  ;;  %v1019_v18 = vpop.permute.xlu1 %1018 }
 0x2fa   : > { %v1026_v26 = vsel %vm1024_vm3, %v1019_v18, %v1021_v17 }
 0x2fd   : > { %v1017_v19 = vpop.permute.xlu0 %1016  ;;  %v1023_v20 = vpop.permute.xlu1 %1022 }
 0x2fe   : > { %v1028_v21 = vsel %vm1024_vm3, %v1023_v20, %v1017_v19  ;;  %v1027_v23 = vsel %vm1024_vm3, %v1017_v19, %v1019_v18  ;;  %v1025_v24 = vsel %vm1024_vm3, %v1021_v17, %v1023_v20 }
 0x2ff   : > { %1033 = vmatprep.subr.mxu0 %v1027_v23  ;;  %1103 = vmatprep.subr.mxu1 %v1025_v24 }
 0x300   : > { %1034 = vmatpush1.msra.mxu0 %v1028_v21  ;;  %1104 = vmatpush1.msra.mxu1 %v1026_v26 }
 0x301   : > { %v1476_v28 = vpop.permute.xlu0 %1475  ;;  %2759 = vmatmul.mubr.msk.f32.vlgmr.msra.gmra.mrb[4].mxu0 %vm537_vm0, %v1029_v25  ;;  %2760 = vmatmul.mubr.msk.f32.vlgmr.msra.gmra.mrb[8].mxu1 %vm537_vm0, %v1029_v25  ;;  %v1478_v29 = vpop.permute.xlu1 %1477 }
 0x302   : > { %1176 = vmatprep.subr.mxu0 %v3189_v30  ;;  %1246 = vmatprep.subr.mxu1 %v3196_v34  ;;  %v1327_v34 = vsel %vm1024_vm3, %v1323_v16, %v1317_v12  ;;  %v1485_v37 = vsel %vm1024_vm3, %v1476_v28, %v1478_v29 }
 0x303   : > { %1177 = vmatpush1.msra.mxu0 %v3183_v22  ;;  %1247 = vmatpush1.msra.mxu1 %v3191_v31  ;;  %v1325_v31 = vsel %vm1024_vm3, %v1319_v13, %v1321_v14 }
 0x304   : > { %1333 = vmatprep.subr.mxu0 %v1326_v32  ;;  %1403 = vmatprep.subr.mxu1 %v1324_v33 }
 0x305   : > { %1240 = vmatprep.mubr.f32.mxu0 %v2996_v0  ;;  %1310 = vmatprep.mubr.f32.mxu1 %v2996_v0  ;;  %v1933_v30 = vpop.permute.xlu0 %1932  ;;  %v1931_v22 = vpop.permute.xlu1 %1930 }
 0x306   : > { %2761 = vmatmul.mubr.msk.f32.vlgmr.msra.gmra.mrb[6].mxu0 %vm537_vm0, %v2758_v36  ;;  %2762 = vmatmul.mubr.msk.f32.vlgmr.msra.gmra.mrb[10].mxu1 %vm537_vm0, %v2758_v36  ;;  %v1938_v53 = vsel %vm1936_vm4, %v1931_v22, %v1933_v30 }
 0x307   : > { %1334 = vmatpush1.msra.mxu0 %v1327_v34  ;;  %1404 = vmatpush1.msra.mxu1 %v1325_v31 }
 0x308   : > { %1492 = vmatprep.subr.mxu0 %v1485_v37  ;;  %1397 = vmatprep.mubr.f32.mxu0 %v2996_v0 }
 0x309   : > { %1467 = vmatprep.mubr.f32.mxu1 %v2996_v0  ;;  %v1480_v39 = vpop.permute.xlu0 %1479  ;;  %v1482_v40 = vpop.permute.xlu1 %1481 }
 0x30a   : > { %v1484_v42 = vsel %vm1024_vm3, %v1478_v29, %v1480_v39  ;;  %2764 = vmatmul.mubr.msk.f32.vlgmr.msra.gmra.mrb[8].mxu0 %vm537_vm0, %v2763_v38  ;;  %2765 = vmatmul.mubr.msk.f32.vlgmr.msra.gmra.mrb[12].mxu1 %vm537_vm0, %v2763_v38  ;;  %v1486_v43 = vsel %vm1024_vm3, %v1482_v40, %v1476_v28  ;;  %v1483_v44 = vsel %vm1024_vm3, %v1480_v39, %v1482_v40 }
 0x30b   : > { %1493 = vmatpush1.msra.mxu0 %v1486_v43  ;;  %1562 = vmatprep.subr.mxu1 %v1483_v44 }
 0x30c   : > { %1556 = vmatprep.mubr.f32.mxu0 %v2996_v0  ;;  %1563 = vmatpush1.msra.mxu1 %v1484_v42 }
 0x30d   : > { %1626 = vmatprep.mubr.f32.mxu1 %v2996_v0  ;;  %1639 = vmatprep.subr.mxu0 %v3223_v45  ;;  %v2089_v49 = vpop.permute.xlu0 %2088  ;;  %v2091_v50 = vpop.permute.xlu1 %2090 }
 0x30e   : > { %2767 = vmatmul.mubr.msk.f32.vlgmr.msra.gmra.mrb[10].mxu0 %vm537_vm0, %v2766_v48  ;;  %2768 = vmatmul.mubr.msk.f32.vlgmr.msra.gmra.mrb[14].mxu1 %vm537_vm0, %v2766_v48 }
 0x30f   : > { %1640 = vmatpush1.msra.mxu0 %v3241_v55  ;;  %1709 = vmatprep.subr.mxu1 %v3243_v56 }
 0x310   : > { %1710 = vmatpush1.msra.mxu1 %v3225_v46  ;;  %1786 = vmatprep.subr.mxu0 %v3257_v1  ;;  %v2772_v46 = vld [vmem:[%s3492_s5 + $0x28] sm:$0xff] }
 0x311   : > { %1856 = vmatprep.subr.mxu1 %v3273_v8  ;;  %1703 = vmatprep.mubr.f32.mxu0 %v2996_v0  ;;  %v2093_v45 = vpop.permute.xlu0 %2092  ;;  %v2095_v52 = vpop.permute.xlu1 %2094 }
 0x312   : > { %1773 = vmatprep.mubr.f32.mxu1 %v2996_v0  ;;  %2770 = vmatmul.mubr.msk.f32.vlgmr.msra.gmra.mrb[12].mxu0 %vm537_vm0, %v2769_v51  ;;  %v2097_v60 = vsel %vm1936_vm4, %v2091_v50, %v2093_v45  ;;  %v2099_v1 = vsel %vm1936_vm4, %v2095_v52, %v2089_v49  ;;  %v2096_v3 = vsel %vm1936_vm4, %v2093_v45, %v2095_v52 }
 0x313   : > { %2771 = vmatmul.mubr.msk.f32.vlgmr.msra.gmra.mrb[16].mxu1 %vm537_vm0, %v2769_v51  ;;  %1787 = vmatpush1.msra.mxu0 %v3255_v63  ;;  %v2098_v63 = vsel %vm1936_vm4, %v2089_v49, %v2091_v50 }
 0x314   : > { %1857 = vmatpush1.msra.mxu1 %v3271_v7  ;;  %1946 = vmatprep.subr.mxu0 %v1938_v53 }
 0x315   : > { %1850 = vmatprep.mubr.f32.mxu0 %v2996_v0  ;;  %1920 = vmatprep.mubr.f32.mxu1 %v2996_v0  ;;  %v1929_v54 = vpop.permute.xlu0 %1928  ;;  %v1935_v55 = vpop.permute.xlu1 %1934 }
 0x316   : > { %v1939_v56 = vsel %vm1936_vm4, %v1929_v54, %v1931_v22  ;;  %2773 = vmatmul.mubr.msk.f32.vlgmr.msra.gmra.mrb[14].mxu0 %vm537_vm0, %v2772_v46  ;;  %v1937_v57 = vsel %vm1936_vm4, %v1933_v30, %v1935_v55  ;;  %v1940_v58 = vsel %vm1936_vm4, %v1935_v55, %v1929_v54 }
 0x317   : > { %2774 = vmatmul.mubr.msk.f32.vlgmr.msra.gmra.mrb[18].mxu1 %vm537_vm0, %v2772_v46  ;;  %1947 = vmatpush1.msra.mxu0 %v1939_v56 }
 0x318   : > { %2016 = vmatprep.subr.mxu1 %v1940_v58  ;;  %2010 = vmatprep.mubr.f32.mxu0 %v2996_v0 }
 0x319   : > { %2017 = vmatpush1.msra.mxu1 %v1937_v57  ;;  %2080 = vmatprep.mubr.f32.mxu1 %v2996_v0  ;;  %v2248_v61 = vpop.permute.xlu0 %2247  ;;  %v2250_v62 = vpop.permute.xlu1 %2249 }
 0x31a   : > { %2105 = vmatprep.subr.mxu0 %v2097_v60  ;;  %2776 = vmatmul.mubr.msk.f32.vlgmr.msra.gmra.mrb[16].mxu0 %vm537_vm0, %v2775_v59  ;;  %v2257_v9 = vsel %vm1936_vm4, %v2248_v61, %v2250_v62 }
 0x31b   : > { %2777 = vmatmul.mubr.msk.f32.vlgmr.msra.gmra.mrb[20].mxu1 %vm537_vm0, %v2775_v59  ;;  %2106 = vmatpush1.msra.mxu0 %v2098_v63 }
 0x31c   : > { %2175 = vmatprep.subr.mxu1 %v2099_v1  ;;  %2169 = vmatprep.mubr.f32.mxu0 %v2996_v0 }
 0x31d   : > { %2176 = vmatpush1.msra.mxu1 %v2096_v3  ;;  %2239 = vmatprep.mubr.f32.mxu1 %v2996_v0  ;;  %v2252_v4 = vpop.permute.xlu0 %2251  ;;  %v2254_v5 = vpop.permute.xlu1 %2253 }
 0x31e   : > { %2779 = vmatmul.mubr.msk.f32.vlgmr.msra.gmra.mrb[18].mxu0 %vm537_vm0, %v2778_v2  ;;  %v2255_v6 = vsel %vm1936_vm4, %v2252_v4, %v2254_v5  ;;  %v2256_v7 = vsel %vm1936_vm4, %v2250_v62, %v2252_v4  ;;  %v2258_v8 = vsel %vm1936_vm4, %v2254_v5, %v2248_v61 }
 0x31f   : > { %2780 = vmatmul.mubr.msk.f32.vlgmr.msra.gmra.mrb[22].mxu1 %vm537_vm0, %v2778_v2  ;;  %2264 = vmatprep.subr.mxu0 %v2256_v7 }
 0x320   : > { %2334 = vmatprep.subr.mxu1 %v2258_v8  ;;  %2265 = vmatpush1.msra.mxu0 %v2257_v9 }
 0x321   : > { %2328 = vmatprep.mubr.f32.mxu0 %v2996_v0  ;;  %2335 = vmatpush1.msra.mxu1 %v2255_v6 }
 0x322   : > { %2398 = vmatprep.mubr.f32.mxu1 %v2996_v0  ;;  %2782 = vmatmul.mubr.msk.f32.vlgmr.msra.gmra.mrb[20].mxu0 %vm537_vm0, %v2781_v10 }
 0x323   : > { %2783 = vmatmul.mubr.msk.f32.vlgmr.msra.gmra.mrb[24].mxu1 %vm537_vm0, %v2781_v10  ;;  %2497 = vmatprep.mubr.f32.mxu0 %v2996_v0 }
 0x32e   : > { %v535_v35 = vpop.permute.xlu0 %534 }
 0x32f   : > { %v618_v11 = vadd.f32 %v3155_v15, %v535_v35  ;;  %v693_v12 = vadd.f32 %v3157_v27, %v535_v35  ;;  %v2429_v15 = vld [vmem:[%s3495_s8] sm:$0xff] }
 0x331   : > { %v700_v13 = vsub.f32 0.0, %v618_v11  ;;  %v701_v14 = vsub.f32 0.0, %v693_v12 }
 0x333   : > { %v710_v16 = vmul.f32 1.442695, %v700_v13  ;;  %v712_v17 = vmul.f32 1.442695, %v701_v14 }
 0x335   : > { %2892 = vpow2.f32 %v710_v16 }
 0x336   : > { %2894 = vpow2.f32 %v712_v17 }
 0x33f   : > { %v2893_v18 = vpop.eup %2892 }
 0x340   : > { %v2895_v19 = vpop.eup %2894  ;;  %v718_v20 = vadd.f32 1.0, %v2893_v18 }
 0x341   : > { %v719_v21 = vadd.f32 1.0, %v2895_v19 }
 0x342   : > { %2896 = vrcp.f32 %v718_v20 }
 0x343   : > { %2898 = vrcp.f32 %v719_v21 }
 0x34c   : > { %v2897_v23 = vpop.eup %2896 }
 0x34d   : > { %v2899_v24 = vpop.eup %2898  ;;  %v730_v25 = vmul.f32 %v2897_v23, %v618_v11  ;;  %v2410_v11 = vpop.permute.xlu1 %2409 }
 0x34e   : > { %v731_v26 = vmul.f32 %v2899_v24, %v693_v12 }
 0x350   : > { %2433 = vmatprep.subr.mxu0 %v731_v26 }
 0x351   : > { %2434 = vmatpush1.msra.mxu0 %v730_v25 }
 0x352   : > { %2784 = vmatmul.mubr.msk.f32.vlgmr.msra.gmra.mrb[22].mxu0 %vm537_vm0, %v2429_v15 }
 0x353   : > { %2571 = vmatprep.mubr.f32.mxu0 %v2996_v0 }
 0x3d4   : > { %v1099_v27 = vpop.f32.mrb[4].mxu0  ;;  %v1169_v28 = vpop.f32.mrb[8].mxu1 }
 0x3d5   : > { %v1100_v29 = vpop.f32.mrb[5].mxu0  ;;  %v1171_v32 = vpop.f32.mrb[9].mxu1 }
 0x3d9   : > { %v1242_v33 = vpop.f32.mrb[6].mxu0  ;;  %v1312_v36 = vpop.f32.mrb[10].mxu1 }
 0x3da   : > { %v1313_v30 = vadd.f32 %v1312_v36, %v1169_v28  ;;  %v1243_v22 = vpop.f32.mrb[7].mxu0  ;;  %v1314_v31 = vpop.f32.mrb[11].mxu1 }
 0x3db   : > { %v1244_v34 = vadd.f32 %v1243_v22, %v1100_v29  ;;  %v2428_v22 = vld [vmem:[%s3494_s7] sm:$0xff]  ;;  %v2582_v31 = vpop.permute.xlu0 %2581 }
 0x3dd   : > { %v1399_v37 = vpop.f32.mrb[8].mxu0  ;;  %v1469_v38 = vpop.f32.mrb[12].mxu1 }
 0x3de   : > { %v1474_v39 = vadd.f32 %v1469_v38, %v1313_v30  ;;  %v1400_v40 = vpop.f32.mrb[9].mxu0  ;;  %v1471_v42 = vpop.f32.mrb[13].mxu1 }
 0x3df   : > { %v1473_v43 = vadd.f32 %v1400_v40, %v1244_v34 }
 0x3e1   : > { %v1558_v44 = vpop.f32.mrb[10].mxu0  ;;  %v1628_v48 = vpop.f32.mrb[14].mxu1 }
 0x3e2   : > { %v1633_v49 = vadd.f32 %v1628_v48, %v1474_v39  ;;  %v1559_v0 = vpop.f32.mrb[11].mxu0  ;;  %v1630_v50 = vpop.f32.mrb[15].mxu1 }
 0x3e3   : > { %v1632_v51 = vadd.f32 %v1559_v0, %v1473_v43 }
 0x3e5   : > { %v1705_v45 = vpop.f32.mrb[12].mxu0 }
 0x3e6   : > { %v1775_v52 = vpop.f32.mrb[16].mxu1  ;;  %v1706_v53 = vpop.f32.mrb[13].mxu0 }
 0x3e7   : > { %v1780_v46 = vadd.f32 %v1775_v52, %v1633_v49  ;;  %v1779_v54 = vadd.f32 %v1706_v53, %v1632_v51  ;;  %v1777_v55 = vpop.f32.mrb[17].mxu1 }
 0x3e9   : > { %v1852_v56 = vpop.f32.mrb[14].mxu0 }
 0x3ea   : > { %v1922_v57 = vpop.f32.mrb[18].mxu1  ;;  %v1853_v58 = vpop.f32.mrb[15].mxu0 }
 0x3eb   : > { %v1927_v59 = vadd.f32 %v1922_v57, %v1780_v46  ;;  %v1926_v60 = vadd.f32 %v1853_v58, %v1779_v54  ;;  %v1924_v61 = vpop.f32.mrb[19].mxu1 }
 0x3ed   : > { %v2012_v62 = vpop.f32.mrb[16].mxu0 }
 0x3ee   : > { %v2082_v63 = vpop.f32.mrb[20].mxu1  ;;  %v2013_v1 = vpop.f32.mrb[17].mxu0 }
 0x3ef   : > { %v2087_v2 = vadd.f32 %v2082_v63, %v1927_v59  ;;  %v2086_v3 = vadd.f32 %v2013_v1, %v1926_v60  ;;  %v2084_v4 = vpop.f32.mrb[21].mxu1 }
 0x3f1   : > { %v2171_v5 = vpop.f32.mrb[18].mxu0 }
 0x3f2   : > { %v2241_v6 = vpop.f32.mrb[22].mxu1  ;;  %v2172_v7 = vpop.f32.mrb[19].mxu0 }
 0x3f3   : > { %v2246_v8 = vadd.f32 %v2241_v6, %v2087_v2  ;;  %v2245_v9 = vadd.f32 %v2172_v7, %v2086_v3  ;;  %v2243_v10 = vpop.f32.mrb[23].mxu1 }
 0x3f5   : > { %v2330_v35 = vpop.f32.mrb[20].mxu0 }
 0x3f6   : > { %v2400_v12 = vpop.f32.mrb[24].mxu1  ;;  %v2331_v13 = vpop.f32.mrb[21].mxu0 }
 0x3f7   : > { %v2405_v14 = vadd.f32 %v2400_v12, %v2246_v8  ;;  %v2404_v16 = vadd.f32 %v2331_v13, %v2245_v9  ;;  %v2402_v17 = vpop.f32.mrb[25].mxu1 }
 0x3f9   : > { %v2412_v18 = vadd.f32 %v2410_v11, %v2404_v16  ;;  %v2413_v19 = vadd.f32 %v2410_v11, %v2405_v14 }
 0x3fb   : > { %v2414_v20 = vsub.f32 0.0, %v2412_v18  ;;  %v2415_v21 = vsub.f32 0.0, %v2413_v19 }
 0x3fd   : > { %v2416_v23 = vmul.f32 1.442695, %v2414_v20  ;;  %v2418_v24 = vmul.f32 1.442695, %v2415_v21 }
 0x3ff   : > { %2900 = vpow2.f32 %v2416_v23 }
 0x400   : > { %2902 = vpow2.f32 %v2418_v24 }
 0x409   : > { %v2901_v25 = vpop.eup %2900 }
 0x40a   : > { %v2903_v26 = vpop.eup %2902  ;;  %v2420_v15 = vadd.f32 1.0, %v2901_v25 }
 0x40b   : > { %v2421_v27 = vadd.f32 1.0, %v2903_v26 }
 0x40c   : > { %2904 = vrcp.f32 %v2420_v15 }
 0x40d   : > { %2906 = vrcp.f32 %v2421_v27 }
 0x416   : > { %v2905_v28 = vpop.eup %2904 }
 0x417   : > { %v2907_v29 = vpop.eup %2906  ;;  %v2424_v32 = vmul.f32 %v2905_v28, %v2412_v18 }
 0x418   : > { %v2425_v33 = vmul.f32 %v2907_v29, %v2413_v19 }
 0x419   : > { %v2426_v36 = vadd.f32 %v2424_v32, %v3159_v41 }
 0x41a   : > { %v2427_v30 = vadd.f32 %v2425_v33, %v3166_v47 }
 0x41c   : > { %2507 = vmatprep.subr.mxu0 %v2427_v30 }
 0x41d   : > { %2508 = vmatpush1.msra.mxu0 %v2426_v36 }
 0x41e   : > { %2785 = vmatmul.mubr.msk.f32.vlgmr.msra.gmra.mrb[22].mxu0 %vm537_vm0, %v2428_v22 }
 0x4f1   : > { %v2573_v34 = vpop.f32.mrb[22].mxu0 }
 0x4f2   : > { %v2584_v37 = vadd.f32 %v2582_v31, %v2573_v34  ;;  %v2575_v38 = vpop.f32.mrb[23].mxu0 }
 0x4f3   : > { %v2585_v39 = vadd.f32 %v2582_v31, %v2575_v38 }
 0x4f4   : > { %v2586_v40 = vsub.f32 0.0, %v2584_v37 }
 0x4f5   : > { %v2587_v42 = vsub.f32 0.0, %v2585_v39 }
 0x4f6   : > { %v2588_v41 = vmul.f32 1.442695, %v2586_v40 }
 0x4f7   : > { %v2590_v43 = vmul.f32 1.442695, %v2587_v42 }
 0x4f8   : > { %2908 = vpow2.f32 %v2588_v41 }
 0x4f9   : > { %2910 = vpow2.f32 %v2590_v43 }
 0x502   : > { %v2909_v47 = vpop.eup %2908 }
 0x503   : > { %v2911_v44 = vpop.eup %2910  ;;  %v2592_v48 = vadd.f32 1.0, %v2909_v47 }
 0x504   : > { %v2593_v49 = vadd.f32 1.0, %v2911_v44 }
 0x505   : > { %2912 = vrcp.f32 %v2592_v48 }
 0x506   : > { %2914 = vrcp.f32 %v2593_v49 }
 0x50f   : > { %v2913_v0 = vpop.eup %2912 }
 0x510   : > { %v2915_v50 = vpop.eup %2914  ;;  %v2596_v51 = vmul.f32 %v2913_v0, %v2584_v37 }
 0x511   : > { %v2597_v45 = vmul.f32 %v2915_v50, %v2585_v39 }
 0x512   : > { %2598 = vst [vmem:[%s496_s14] sm:$0xff] %v2596_v51 }
 0x513   : > { %2599 = vst [vmem:[%s496_s14 + $0x8] sm:$0xff] %v2597_v45 }
 0x514   : > { %2929 = shalt.err (!%p2926_p5)
}
 0x515   : > { %s2930_s29 = scalar_lea.hbm %s3440_s22, 256  ;;  %s2934_s17 = scalar_lea.hbm %s3500_s13, 512 }
 0x516   : > { %p2931_p6 = scmp.ne.s32.totalorder %s3440_s22, %s2930_s29  ;;  %p2935_p10 = scmp.lt.u32.totalorder %s3440_s22, %s3500_s13 }
 0x517   : > { %p2936_p11 = scmp.lt.u32.totalorder %s2934_s17, %s2930_s29  ;;  %p2938_p13 = scmp.lt.u32.totalorder %s2930_s29, %s3440_s22 }
 0x518   : > { %p2932_p7 = pnand %p2931_p6, %p3113_p4 }
 0x519   : > { %p2937_p12 = por %p2936_p11, %p2935_p10 }
 0x51a   : > { %p2933_p9 = pneg %p2932_p7 }
 0x51b   : > { %p2939_p0 = por %p2938_p13, %p2937_p12 }
 0x51d   : > { %p2940_p1 = pnand %p2939_p0, %p2933_p9 }
 0x51f   : > { %2943 = shalt.err (!%p2940_p1)
}
 0x520   : > { %2797 = dma.vmem_to_hbm [thread:$0]  (%p3113_p4), %s3442_s15, 256, %s3440_s22, %s2601_s23  }
 0x521 PF: > { %p2803_p2 = scmp.ge.s32.totalorder %s2994_s30, 2  ;;  %s2629_s0 = sand.u32 1, %s2974_s25  }
 0x522   : > { %s2630_s28 = scalar_lea.sflag [#allocation3], %s2629_s0 }
 0x523   : > { %p2800_p3 = pnand %p2803_p2, %p3120_p8 }
 0x525   : > { %2969 = dma.done.wait (!%p2800_p3), %s2630_s28, 256  }
 0x526   : > { %2971 = vsyncadd (!%p2800_p3), %s2630_s28, 4294967040  ;;  %s26_s30 = sadd.s32 1, %s2994_s30   ;;  %s3510_s18 = sld [smem:[#allocation7_spill]] }
 0x527   : > { %p23_p5 = scmp.ge.s32.totalorder %s26_s30, 4   ;;  %s3511_s28 = sld [smem:[#allocation5_spill]] }
 0x528   : > { %s3512_s29 = sld [smem:[#allocation6_spill]]  ;;  %s3513_s25 = smov %s2978_s26 }
 0x529   : > { %s3514_s26 = smov %s2982_s27  ;;  %25 = sbr.rel (!%p23_p5) target bundleno = 6 (0x6), region = 124 }
 0x52c   : > { %s3515_s27 = smov %s3510_s18 }
 0x530   :  { %2635 = vsyncpa [#allocation3], 1 }
 0x531   :  { %2637 = vsyncpa [#allocation3 + $0x1], 1 }

</bundles_post_ra>
